<compile_context>
chip_gen: v7x
topology: tpu7x:2x2x1
jax: 0.10.0
libtpu: 0.0.40
codegen_flags: <defaults>
</compile_context>

<pallas_src>
import functools

import jax
import jax.numpy as jnp
from jax import lax
from jax.experimental import pallas as pl
from jax.experimental.pallas import tpu as pltpu


def _round_up(v, m):
    return ((v + m - 1) // m) * m


# ----------------------------------------------------------------------------
# Pallas kernel: fused SharedMLP (2x folded conv+BN+ReLU) + max-pool over nsample
# ----------------------------------------------------------------------------
def _mlp_maxpool_kernel(ns, x_ref, w1_ref, b1_ref, w2_ref, b2_ref, o_ref):
    # x_ref  : (C0, ns*TILE_NP) bf16   -- lane axis ordered [sample s][point p]
    # w1_ref : (Hp, C0)  bf16          b1_ref : (Hp, 1)  f32
    # w2_ref : (C2p, Hp) bf16          b2_ref : (C2p, 1) f32
    # o_ref  : (C_out, TILE_NP) f32    (PyTorch channels-first output tile)
    c_out = o_ref.shape[0]
    tile_np = o_ref.shape[1]

    # Layer 1: one wide MXU matmul over all samples at once, + bias + ReLU.
    h = jnp.dot(w1_ref[...], x_ref[...], preferred_element_type=jnp.float32)
    h = jnp.maximum(h + b1_ref[...], 0.0).astype(jnp.bfloat16)      # (Hp, ns*tile_np)

    # Layer 2 fused with the max-pool over nsample: per-sample aligned lane
    # slices of h, contraction dim = Hp (MXU friendly), running max as a value.
    w2 = w2_ref[...]
    acc = None
    for s in range(ns):
        hs = h[:, s * tile_np:(s + 1) * tile_np]                     # (Hp, tile_np)
        ys = jnp.dot(w2, hs, preferred_element_type=jnp.float32)[:c_out, :]
        acc = ys if acc is None else jnp.maximum(acc, ys)

    # Bias + ReLU hoisted out of the loop (commute with max for a shared bias).
    o_ref[...] = jnp.maximum(acc + b2_ref[:c_out, :], 0.0)


def _pick_tile_np(np_total, ns, c0, hp, c2p, c_out):
    """Largest npoint tile (multiple of 128 dividing npoint) whose per-step
    working set (double-buffered blocks + wide layer-1 activation) stays within
    ~40 MiB so the pipeline also fits v7x's 64 MiB VMEM."""
    budget = 40 * 2 ** 20

    def need(t):
        x_blk = 2 * (ns * c0 * t * 2)            # bf16 input block, double-buffered
        out_blk = 2 * (c_out * t * 4)            # f32 output block, double-buffered
        h_tmp = hp * ns * t * 6                  # layer-1 act: f32 dot result + bf16 copy
        acc_b = 2 * c2p * t * 4                  # per-sample result + running max
        w = 2 * (hp * c0 * 2 + c2p * hp * 2 + (hp + c2p) * 4)
        return x_blk + out_blk + h_tmp + acc_b + w

    for t in (512, 256, 128):
        if np_total % t == 0 and need(t) <= budget:
            return t
    return 128 if np_total % 128 == 0 else np_total


def shared_mlp_maxpool(x, w1t, b1, w2t, b2, out_channels, nsample):
    """x: (B, n_tiles, C0, nsample*TILE_NP) bf16 -> (B, out_channels, npoint) f32."""
    B, n_tiles, C0, wide = x.shape
    tile_np = wide // nsample
    NP = n_tiles * tile_np
    Hp = w1t.shape[0]
    C2p = w2t.shape[0]

    # VMEM budget: double-buffered in/out blocks + resident weights + layer-1 act.
    x_blk = 2 * C0 * wide * 2
    out_blk = 2 * out_channels * tile_np * 4
    h_tmp = Hp * wide * 6
    acc_bytes = 2 * C2p * tile_np * 4
    w_bytes = 2 * (Hp * C0 * 2 + C2p * Hp * 2 + (Hp + C2p) * 4)
    need = x_blk + out_blk + h_tmp + acc_bytes + w_bytes
    vmem_limit = int(min(max(need + (4 << 20), 16 << 20), 48 << 20))

    flops = 2 * B * NP * nsample * (C0 * Hp + Hp * C2p)
    bytes_accessed = (int(x.size) * 2 + B * out_channels * NP * 4
                      + (Hp * C0 + C2p * Hp) * 2 + (Hp + C2p) * 4)

    kernel = functools.partial(_mlp_maxpool_kernel, nsample)
    return pl.pallas_call(
        kernel,
        out_shape=jax.ShapeDtypeStruct((B, out_channels, NP), jnp.float32),
        grid=(B, n_tiles),
        in_specs=[
            # NOTE: if xprof shows exposed input DMA, add
            # pipeline_mode=pl.Buffered(3) on this spec.
            pl.BlockSpec((None, None, C0, wide), lambda b, i: (b, i, 0, 0)),
            pl.BlockSpec((Hp, C0), lambda b, i: (0, 0)),
            pl.BlockSpec((Hp, 1), lambda b, i: (0, 0)),
            pl.BlockSpec((C2p, Hp), lambda b, i: (0, 0)),
            pl.BlockSpec((C2p, 1), lambda b, i: (0, 0)),
        ],
        out_specs=pl.BlockSpec((None, out_channels, tile_np), lambda b, i: (b, 0, i)),
        compiler_params=pltpu.CompilerParams(
            dimension_semantics=("parallel", "parallel"),
            vmem_limit_bytes=vmem_limit),
        cost_estimate=pl.CostEstimate(
            flops=flops, transcendentals=0, bytes_accessed=bytes_accessed),
    )(x, w1t, b1, w2t, b2)


# ----------------------------------------------------------------------------
# Glue ops (data-dependent sampling / grouping) in plain JAX
# ----------------------------------------------------------------------------
def furthest_point_sample(xyz, npoint):
    """xyz: (B, N, 3) -> inds (B, npoint) int32. Matches the CUDA FPS (start idx 0)."""
    B, N, _ = xyz.shape

    def per_batch(pts):
        inds0 = jnp.zeros((npoint,), jnp.int32)            # inds[0] = 0
        dists0 = jnp.full((N,), 1e10, jnp.float32)

        def body(i, state):
            dists, inds, last = state
            d = jnp.sum((pts - pts[last]) ** 2, axis=-1)
            dists = jnp.minimum(dists, d)
            nxt = jnp.argmax(dists).astype(jnp.int32)
            inds = inds.at[i].set(nxt)
            return dists, inds, nxt

        _, inds, _ = lax.fori_loop(1, npoint, body, (dists0, inds0, jnp.int32(0)))
        return inds

    return jax.vmap(per_batch)(xyz)


def ball_query(radius, nsample, xyz, new_xyz):
    """xyz: (B, N, 3), new_xyz: (B, M, 3) -> idx (B, M, nsample) int32.

    First `nsample` in-radius indices (original order); remaining slots filled
    with the first hit; all zeros when a center has no in-radius neighbor
    (matches the zero-initialized CUDA kernel).
    """
    B, N, _ = xyz.shape
    M = new_xyz.shape[1]
    # TODO(synk): chunk over N for very large point clouds to avoid the full
    # (B, M, N) mask / cumsum.
    d2 = jnp.sum((new_xyz[:, :, None, :] - xyz[:, None, :, :]) ** 2, axis=-1)  # (B,M,N)
    valid = d2 < radius * radius
    cum = jnp.cumsum(valid.astype(jnp.int32), axis=-1)                         # (B,M,N)
    cnt = cum[..., -1]                                                         # (B,M)
    targets = jnp.arange(1, nsample + 1, dtype=jnp.int32)
    idx = jax.vmap(lambda c: jnp.searchsorted(c, targets, side="left"))(
        cum.reshape(B * M, N))
    idx = idx.reshape(B, M, nsample).astype(jnp.int32)
    first = jnp.where(cnt > 0, idx[..., 0], 0).astype(jnp.int32)
    k = jnp.arange(nsample, dtype=jnp.int32)
    return jnp.where(k[None, None, :] < cnt[..., None], idx, first[..., None])


def group_points_tiled(xyz, features, new_xyz, idx, tile_np, use_xyz=True):
    """QueryAndGroup emitting the kernel's layout directly:
    (B, n_tiles, C0, nsample*tile_np) bf16, lane axis ordered [sample][point].

    The gather writes straight into the tiled layout (no post-hoc transpose of
    the nsample-amplified tensor); center subtraction + bf16 cast fuse under jit.
    """
    B, N, _ = xyz.shape
    NP, NS = idx.shape[1], idx.shape[2]
    n_tiles = NP // tile_np
    xyz_cf = jnp.transpose(xyz, (0, 2, 1))                       # (B, 3, N)

    if features is not None:
        src = jnp.concatenate([xyz_cf, features], axis=1) if use_xyz else features
    else:
        src = xyz_cf                                              # grouped_xyz only
    C0 = src.shape[1]

    # idx: (B, NP, NS) -> (B, n_tiles, NS, tile_np)
    idx_t = jnp.transpose(idx.reshape(B, n_tiles, tile_np, NS), (0, 1, 3, 2))

    def gather_tile(s, ii):                                       # (C0,N),(NS,tile)->(C0,NS,tile)
        return s[:, ii]

    gather_b = jax.vmap(jax.vmap(gather_tile, in_axes=(None, 0)), in_axes=(0, 0))
    g = gather_b(src, idx_t)                                      # (B, n_tiles, C0, NS, tile_np)

    if use_xyz or features is None:
        # subtract the center coordinates from the xyz channels only
        nx_cf = jnp.transpose(new_xyz, (0, 2, 1)).reshape(B, 3, n_tiles, tile_np)
        nx_cf = jnp.transpose(nx_cf, (0, 2, 1, 3))                # (B, n_tiles, 3, tile_np)
        pad = jnp.zeros((B, n_tiles, C0 - 3, tile_np), src.dtype)
        offset = jnp.concatenate([nx_cf, pad], axis=2)            # (B, n_tiles, C0, tile_np)
        g = g - offset[:, :, :, None, :]

    return g.reshape(B, n_tiles, C0, NS * tile_np).astype(jnp.bfloat16)


# ----------------------------------------------------------------------------
# Parameter init (deterministic) with eval-mode BN folding + kernel packing
# ----------------------------------------------------------------------------
def init_folded_params(key, mlp_spec, eps=1e-5, pad_to=128):
    """Conv2d(1x1, bias=False)+BN folded (running stats), transposed to
    (C_out, C_in), zero-padded to `pad_to` rows, weights cast to bf16.
    Returns (w1t, b1, w2t, b2, out_channels)."""
    assert len(mlp_spec) == 3, "kernel packs exactly two conv+BN+ReLU layers"
    folded = []
    for i in range(len(mlp_spec) - 1):
        c_in, c_out = mlp_spec[i], mlp_spec[i + 1]
        key, kw = jax.random.split(key)
        w = 0.1 * jax.random.normal(kw, (c_in, c_out), jnp.float32)
        gamma = 1.0 + 0.01 * jnp.arange(c_out, dtype=jnp.float32)
        beta = 0.01 * jnp.arange(c_out, dtype=jnp.float32)
        mean = jnp.zeros((c_out,), jnp.float32)
        var = jnp.ones((c_out,), jnp.float32)
        scale = gamma / jnp.sqrt(var + eps)
        folded.append((w * scale[None, :], beta - mean * scale))

    (w1, b1), (w2, b2) = folded
    c0, h, c2 = mlp_spec
    hp, c2p = _round_up(h, pad_to), _round_up(c2, pad_to)

    # layer 1: (hp, c0) -- contraction dim kept at true c0 (the grouped input is
    # NOT channel-padded in HBM, to keep its DMA bytes minimal).
    w1t = jnp.zeros((hp, c0), jnp.float32).at[:h, :].set(w1.T).astype(jnp.bfloat16)
    b1p = jnp.zeros((hp, 1), jnp.float32).at[:h, 0].set(b1)
    # layer 2: (c2p, hp) -- padded rows/cols are zero so they contribute nothing.
    w2t = jnp.zeros((c2p, hp), jnp.float32).at[:c2, :h].set(w2.T).astype(jnp.bfloat16)
    b2p = jnp.zeros((c2p, 1), jnp.float32).at[:c2, 0].set(b2)
    return w1t, b1p, w2t, b2p, c2


# ----------------------------------------------------------------------------
# Full module forward (pooling='max', normalize_xyz=False, ret_unique_cnt=False)
# ----------------------------------------------------------------------------
def pointnet_sa_module_votes_forward(xyz, features, w1t, b1, w2t, b2, *,
                                     out_channels, npoint, radius, nsample,
                                     use_xyz=True):
    """xyz: (B, N, 3), features: (B, C, N).
    Returns new_xyz (B, npoint, 3), new_features (B, C_out, npoint), inds (B, npoint)."""
    inds = furthest_point_sample(xyz, npoint)                        # (B, npoint)
    new_xyz = jnp.take_along_axis(xyz, inds[..., None], axis=1)      # (B, npoint, 3)
    idx = ball_query(radius, nsample, xyz, new_xyz)                  # (B, npoint, nsample)

    feat_c = features.shape[1] if features is not None else 0
    C0 = (3 if (use_xyz or features is None) else 0) + feat_c
    tile_np = _pick_tile_np(npoint, nsample, C0, w1t.shape[0], w2t.shape[0],
                            out_channels)

    x = group_points_tiled(xyz, features, new_xyz, idx, tile_np,
                           use_xyz=use_xyz)                          # (B, nt, C0, NS*tile)
    new_features = shared_mlp_maxpool(x, w1t, b1, w2t, b2,
                                      out_channels, nsample)         # (B, C_out, NP) f32
    return new_xyz, new_features, inds


if __name__ == "__main__":
    key = jax.random.PRNGKey(0)
    k_xyz, k_feat, k_param = jax.random.split(key, 3)

    # Small deterministic shapes consistent with the module
    B, N, C = 2, 16, 4
    npoint, radius, nsample = 8, 0.4, 8
    mlp = [C, 16, 32]
    mlp_spec = [mlp[0] + 3] + mlp[1:]          # use_xyz adds 3 channels -> [7, 16, 32]

    xyz = jax.random.uniform(k_xyz, (B, N, 3), jnp.float32)
    features = jax.random.normal(k_feat, (B, C, N), jnp.float32)
    w1t, b1, w2t, b2, c_out = init_folded_params(k_param, mlp_spec)

    fwd = jax.jit(pointnet_sa_module_votes_forward,
                  static_argnames=("out_channels", "npoint", "radius",
                                   "nsample", "use_xyz"))
    new_xyz, new_features, inds = fwd(xyz, features, w1t, b1, w2t, b2,
                                      out_channels=c_out, npoint=npoint,
                                      radius=radius, nsample=nsample, use_xyz=True)
    jax.block_until_ready((new_xyz, new_features, inds))

    assert new_xyz.shape == (B, npoint, 3)
    assert new_features.shape == (B, mlp_spec[-1], npoint)
    assert inds.shape == (B, npoint)
    print("KERNEL_OK")
</pallas_src>

<mosaic_0001>
module attributes {stable_mosaic.version = 11 : i64} {
  func.func @_mlp_maxpool_kernel(%arg0: i32, %arg1: i32, %arg2: memref<1x1x7x64xbf16, #tpu.memory_space<vmem>>, %arg3: memref<128x7xbf16, #tpu.memory_space<vmem>>, %arg4: memref<128x1xf32, #tpu.memory_space<vmem>>, %arg5: memref<128x128xbf16, #tpu.memory_space<vmem>>, %arg6: memref<128x1xf32, #tpu.memory_space<vmem>>, %arg7: memref<1x32x8xf32, #tpu.memory_space<vmem>>) attributes {dimension_semantics = [#tpu.dimension_semantics<parallel>, #tpu.dimension_semantics<parallel>], iteration_bounds = array<i64: 2, 1>, scalar_prefetch = 0 : i64, scratch_operands = 0 : i64, tpu.core_type = #tpu.core_type<tc>, window_params = [{transform_indices = @transform_0, window_bounds = array<i64: 1, 1, 7, 64>}, {pipeline_mode = #tpu.pipeline_mode<synchronous>, transform_indices = @transform_1, window_bounds = array<i64: 128, 7>}, {pipeline_mode = #tpu.pipeline_mode<synchronous>, transform_indices = @transform_2, window_bounds = array<i64: 128, 1>}, {pipeline_mode = #tpu.pipeline_mode<synchronous>, transform_indices = @transform_3, window_bounds = array<i64: 128, 128>}, {pipeline_mode = #tpu.pipeline_mode<synchronous>, transform_indices = @transform_4, window_bounds = array<i64: 128, 1>}, {transform_indices = @transform_5, window_bounds = array<i64: 1, 32, 8>}]} {
    %c0 = arith.constant 0 : index
    %c0_0 = arith.constant 0 : index
    %0 = vector.load %arg3[%c0, %c0_0] : memref<128x7xbf16, #tpu.memory_space<vmem>>, vector<128x7xbf16>
    %c0_1 = arith.constant 0 : index
    %c0_2 = arith.constant 0 : index
    %c0_3 = arith.constant 0 : index
    %c0_4 = arith.constant 0 : index
    %1 = vector.load %arg2[%c0_1, %c0_2, %c0_3, %c0_4] : memref<1x1x7x64xbf16, #tpu.memory_space<vmem>>, vector<1x1x7x64xbf16>
    %2 = vector.shape_cast %1 : vector<1x1x7x64xbf16> to vector<7x64xbf16>
    %cst = arith.constant dense<0.000000e+00> : vector<128x64xf32>
    %3 = tpu.matmul %0, %2, %cst {dimension_numbers = #tpu.dot_dimension_numbers<[1], [0], [0], [1], [0, 0, 1, 1], [], []>} : vector<128x7xbf16>, vector<7x64xbf16>, vector<128x64xf32> -> vector<128x64xf32>
    %c0_5 = arith.constant 0 : index
    %c0_6 = arith.constant 0 : index
    %4 = vector.load %arg4[%c0_5, %c0_6] : memref<128x1xf32, #tpu.memory_space<vmem>>, vector<128x1xf32>
    %5 = vector.broadcast %4 : vector<128x1xf32> to vector<128x64xf32>
    %6 = arith.addf %3, %5 : vector<128x64xf32>
    %cst_7 = arith.constant 0.000000e+00 : f32
    %7 = vector.broadcast %cst_7 : f32 to vector<128x64xf32>
    %8 = arith.maximumf %6, %7 : vector<128x64xf32>
    %9 = arith.truncf %8 : vector<128x64xf32> to vector<128x64xbf16>
    %c0_8 = arith.constant 0 : index
    %c0_9 = arith.constant 0 : index
    %10 = vector.load %arg5[%c0_8, %c0_9] : memref<128x128xbf16, #tpu.memory_space<vmem>>, vector<128x128xbf16>
    %11 = vector.extract_strided_slice %9 {offsets = [0, 0], sizes = [128, 8], strides = [1, 1]} : vector<128x64xbf16> to vector<128x8xbf16>
    %cst_10 = arith.constant dense<0.000000e+00> : vector<128x8xf32>
    %12 = tpu.matmul %10, %11, %cst_10 {dimension_numbers = #tpu.dot_dimension_numbers<[1], [0], [0], [1], [0, 0, 1, 1], [], []>} : vector<128x128xbf16>, vector<128x8xbf16>, vector<128x8xf32> -> vector<128x8xf32>
    %13 = vector.extract_strided_slice %12 {offsets = [0, 0], sizes = [32, 8], strides = [1, 1]} : vector<128x8xf32> to vector<32x8xf32>
    %14 = vector.extract_strided_slice %9 {offsets = [0, 8], sizes = [128, 8], strides = [1, 1]} : vector<128x64xbf16> to vector<128x8xbf16>
    %cst_11 = arith.constant dense<0.000000e+00> : vector<128x8xf32>
    %15 = tpu.matmul %10, %14, %cst_11 {dimension_numbers = #tpu.dot_dimension_numbers<[1], [0], [0], [1], [0, 0, 1, 1], [], []>} : vector<128x128xbf16>, vector<128x8xbf16>, vector<128x8xf32> -> vector<128x8xf32>
    %16 = vector.extract_strided_slice %15 {offsets = [0, 0], sizes = [32, 8], strides = [1, 1]} : vector<128x8xf32> to vector<32x8xf32>
    %17 = arith.maximumf %13, %16 : vector<32x8xf32>
    %18 = vector.extract_strided_slice %9 {offsets = [0, 16], sizes = [128, 8], strides = [1, 1]} : vector<128x64xbf16> to vector<128x8xbf16>
    %cst_12 = arith.constant dense<0.000000e+00> : vector<128x8xf32>
    %19 = tpu.matmul %10, %18, %cst_12 {dimension_numbers = #tpu.dot_dimension_numbers<[1], [0], [0], [1], [0, 0, 1, 1], [], []>} : vector<128x128xbf16>, vector<128x8xbf16>, vector<128x8xf32> -> vector<128x8xf32>
    %20 = vector.extract_strided_slice %19 {offsets = [0, 0], sizes = [32, 8], strides = [1, 1]} : vector<128x8xf32> to vector<32x8xf32>
    %21 = arith.maximumf %17, %20 : vector<32x8xf32>
    %22 = vector.extract_strided_slice %9 {offsets = [0, 24], sizes = [128, 8], strides = [1, 1]} : vector<128x64xbf16> to vector<128x8xbf16>
    %cst_13 = arith.constant dense<0.000000e+00> : vector<128x8xf32>
    %23 = tpu.matmul %10, %22, %cst_13 {dimension_numbers = #tpu.dot_dimension_numbers<[1], [0], [0], [1], [0, 0, 1, 1], [], []>} : vector<128x128xbf16>, vector<128x8xbf16>, vector<128x8xf32> -> vector<128x8xf32>
    %24 = vector.extract_strided_slice %23 {offsets = [0, 0], sizes = [32, 8], strides = [1, 1]} : vector<128x8xf32> to vector<32x8xf32>
    %25 = arith.maximumf %21, %24 : vector<32x8xf32>
    %26 = vector.extract_strided_slice %9 {offsets = [0, 32], sizes = [128, 8], strides = [1, 1]} : vector<128x64xbf16> to vector<128x8xbf16>
    %cst_14 = arith.constant dense<0.000000e+00> : vector<128x8xf32>
    %27 = tpu.matmul %10, %26, %cst_14 {dimension_numbers = #tpu.dot_dimension_numbers<[1], [0], [0], [1], [0, 0, 1, 1], [], []>} : vector<128x128xbf16>, vector<128x8xbf16>, vector<128x8xf32> -> vector<128x8xf32>
    %28 = vector.extract_strided_slice %27 {offsets = [0, 0], sizes = [32, 8], strides = [1, 1]} : vector<128x8xf32> to vector<32x8xf32>
    %29 = arith.maximumf %25, %28 : vector<32x8xf32>
    %30 = vector.extract_strided_slice %9 {offsets = [0, 40], sizes = [128, 8], strides = [1, 1]} : vector<128x64xbf16> to vector<128x8xbf16>
    %cst_15 = arith.constant dense<0.000000e+00> : vector<128x8xf32>
    %31 = tpu.matmul %10, %30, %cst_15 {dimension_numbers = #tpu.dot_dimension_numbers<[1], [0], [0], [1], [0, 0, 1, 1], [], []>} : vector<128x128xbf16>, vector<128x8xbf16>, vector<128x8xf32> -> vector<128x8xf32>
    %32 = vector.extract_strided_slice %31 {offsets = [0, 0], sizes = [32, 8], strides = [1, 1]} : vector<128x8xf32> to vector<32x8xf32>
    %33 = arith.maximumf %29, %32 : vector<32x8xf32>
    %34 = vector.extract_strided_slice %9 {offsets = [0, 48], sizes = [128, 8], strides = [1, 1]} : vector<128x64xbf16> to vector<128x8xbf16>
    %cst_16 = arith.constant dense<0.000000e+00> : vector<128x8xf32>
    %35 = tpu.matmul %10, %34, %cst_16 {dimension_numbers = #tpu.dot_dimension_numbers<[1], [0], [0], [1], [0, 0, 1, 1], [], []>} : vector<128x128xbf16>, vector<128x8xbf16>, vector<128x8xf32> -> vector<128x8xf32>
    %36 = vector.extract_strided_slice %35 {offsets = [0, 0], sizes = [32, 8], strides = [1, 1]} : vector<128x8xf32> to vector<32x8xf32>
    %37 = arith.maximumf %33, %36 : vector<32x8xf32>
    %38 = vector.extract_strided_slice %9 {offsets = [0, 56], sizes = [128, 8], strides = [1, 1]} : vector<128x64xbf16> to vector<128x8xbf16>
    %cst_17 = arith.constant dense<0.000000e+00> : vector<128x8xf32>
    %39 = tpu.matmul %10, %38, %cst_17 {dimension_numbers = #tpu.dot_dimension_numbers<[1], [0], [0], [1], [0, 0, 1, 1], [], []>} : vector<128x128xbf16>, vector<128x8xbf16>, vector<128x8xf32> -> vector<128x8xf32>
    %40 = vector.extract_strided_slice %39 {offsets = [0, 0], sizes = [32, 8], strides = [1, 1]} : vector<128x8xf32> to vector<32x8xf32>
    %41 = arith.maximumf %37, %40 : vector<32x8xf32>
    %c0_18 = arith.constant 0 : index
    %c0_19 = arith.constant 0 : index
    %42 = vector.load %arg6[%c0_18, %c0_19] : memref<128x1xf32, #tpu.memory_space<vmem>>, vector<32x1xf32>
    %43 = vector.broadcast %42 : vector<32x1xf32> to vector<32x8xf32>
    %44 = arith.addf %41, %43 : vector<32x8xf32>
    %cst_20 = arith.constant 0.000000e+00 : f32
    %45 = vector.broadcast %cst_20 : f32 to vector<32x8xf32>
    %46 = arith.maximumf %44, %45 : vector<32x8xf32>
    %c0_21 = arith.constant 0 : index
    %c0_22 = arith.constant 0 : index
    %c0_23 = arith.constant 0 : index
    %47 = vector.load %arg7[%c0_21, %c0_22, %c0_23] : memref<1x32x8xf32, #tpu.memory_space<vmem>>, vector<1x32x8xf32>
    %48 = vector.shape_cast %47 : vector<1x32x8xf32> to vector<32x8xf32>
    %49 = vector.shape_cast %46 : vector<32x8xf32> to vector<1x32x8xf32>
    tpu.vector_store %arg7[%c0_21, %c0_22, %c0_23], %49 {strides = array<i32>} : memref<1x32x8xf32, #tpu.memory_space<vmem>>, vector<1x32x8xf32>,
    return
  }
  func.func @transform_0(%arg0: i32, %arg1: i32) -> (i32, i32, i32, i32) {
    %c0_i32 = arith.constant 0 : i32
    %c0_i32_0 = arith.constant 0 : i32
    %c0_i32_1 = arith.constant 0 : i32
    return %arg0, %arg1, %c0_i32, %c0_i32_0 : i32, i32, i32, i32
  }
  func.func @transform_1(%arg0: i32, %arg1: i32) -> (i32, i32) {
    %c0_i32 = arith.constant 0 : i32
    %c0_i32_0 = arith.constant 0 : i32
    %c0_i32_1 = arith.constant 0 : i32
    return %c0_i32, %c0_i32_0 : i32, i32
  }
  func.func @transform_2(%arg0: i32, %arg1: i32) -> (i32, i32) {
    %c0_i32 = arith.constant 0 : i32
    %c0_i32_0 = arith.constant 0 : i32
    %c0_i32_1 = arith.constant 0 : i32
    return %c0_i32, %c0_i32_0 : i32, i32
  }
  func.func @transform_3(%arg0: i32, %arg1: i32) -> (i32, i32) {
    %c0_i32 = arith.constant 0 : i32
    %c0_i32_0 = arith.constant 0 : i32
    %c0_i32_1 = arith.constant 0 : i32
    return %c0_i32, %c0_i32_0 : i32, i32
  }
  func.func @transform_4(%arg0: i32, %arg1: i32) -> (i32, i32) {
    %c0_i32 = arith.constant 0 : i32
    %c0_i32_0 = arith.constant 0 : i32
    %c0_i32_1 = arith.constant 0 : i32
    return %c0_i32, %c0_i32_0 : i32, i32
  }
  func.func @transform_5(%arg0: i32, %arg1: i32) -> (i32, i32, i32) {
    %c0_i32 = arith.constant 0 : i32
    %c0_i32_0 = arith.constant 0 : i32
    return %arg0, %c0_i32, %arg1 : i32, i32, i32
  }
}

</mosaic_0001>

<bundles_post_ra>
// kernel: custom-call.10
= control target key start
LH: loop header
LB: loop body
LE: loop exit
PB: predicated region body
PF: predicated region fallthrough
CT: control target
= control target key end

     0   :  { %s6_s0 = inlined_call_operand.vmem [shape: f32[2,16], index: 0, kind: output, shape index: {}]  }

// kernel: custom-call.9
= control target key start
LH: loop header
LB: loop body
LE: loop exit
PB: predicated region body
PF: predicated region fallthrough
CT: control target
= control target key end

     0   :  { %s6_s0 = inlined_call_operand.vmem [shape: u32[16,8], index: 0, kind: output, shape index: {}]  }

// kernel: squeeze.9
= control target key start
LH: loop header
LB: loop body
LE: loop exit
PB: predicated region body
PF: predicated region fallthrough
CT: control target
= control target key end

     0   :  { %s130_s8 = smov 104   ;;  %s131_s9 = smov 112   ;;  %vm7_vm0 = vcmask 64512   ;;  %s221_s0 = inlined_call_operand.vmem [shape: s32[128], index: 0, kind: input, shape index: {}]   ;;  %s222_s1 = inlined_call_operand.vmem [shape: s32[16,8], index: 1, kind: output, shape index: {}]  }
   0x1   :  { %v4_v0 = vld [vmem:[%s221_s0] sm:$0x1]  ;;  %s129_s0 = smov 120   ;;  %s132_s10 = smov 96  }
   0x2   :  { %5 = vst [vmem:[#allocation0] sm:$0x1] %v4_v0  ;;  %s133_s11 = smov 88   ;;  %s134_s12 = smov 80  }
   0x3   :  { %s135_s13 = smov 72   ;;  %s136_s14 = smov 64  }
   0x4   :  { %s137_s17 = smov 56   ;;  %s138_s18 = smov 48  }
   0x5   :  { %s139_s19 = smov 40   ;;  %s140_s20 = smov 32  }
   0x6   :  { %s141_s21 = smov 24   ;;  %s142_s22 = smov 16  }
   0x7   :  { %s143_s23 = smov 8  }
   0x9   :  { %v9_v1 = vld [vmem:[#allocation0] sm:$0x1]  }
   0xa   :  { %v21_v2 = vld [vmem:[#allocation0] sm:$0x1]   ;;  %10 = vrot.lane.b32.xlu0 %v9_v1, %s129_s0 }
   0xb   :  { %22 = vrot.lane.b32.xlu1 %v21_v2, %s130_s8  ;;  %v15_v3 = vld [vmem:[#allocation0] sm:$0x1]  }
   0xc   :  { %v27_v4 = vld [vmem:[#allocation0] sm:$0x1]  }
   0xd   :  { %v33_v5 = vld [vmem:[#allocation0] sm:$0x1]  }
   0xe   :  { %16 = vrot.lane.b32.xlu0 %v15_v3, %s131_s9  ;;  %v39_v6 = vld [vmem:[#allocation0] sm:$0x1]  }
   0xf   :  { %28 = vrot.lane.b32.xlu1 %v27_v4, %s132_s10  ;;  %v45_v7 = vld [vmem:[#allocation0] sm:$0x1]  }
  0x10   :  { %v51_v8 = vld [vmem:[#allocation0] sm:$0x1]  }
  0x11   :  { %v57_v9 = vld [vmem:[#allocation0] sm:$0x1]  }
  0x12   :  { %34 = vrot.lane.b32.xlu0 %v33_v5, %s133_s11  ;;  %v63_v10 = vld [vmem:[#allocation0] sm:$0x1]  }
  0x13   :  { %40 = vrot.lane.b32.xlu1 %v39_v6, %s134_s12  ;;  %v6_v11 = vld [vmem:[#allocation0] sm:$0x1]  }
  0x14   :  { %8 = vst.msk [vmem:[%s222_s1] sm:$0x1] %vm7_vm0, %v6_v11   ;;  %v69_v12 = vld [vmem:[#allocation0] sm:$0x1]  }
  0x15   :  { %v75_v13 = vld [vmem:[#allocation0] sm:$0x1]  }
  0x16   :  { %46 = vrot.lane.b32.xlu0 %v45_v7, %s135_s13  ;;  %v81_v14 = vld [vmem:[#allocation0] sm:$0x1]  }
  0x17   :  { %52 = vrot.lane.b32.xlu1 %v51_v8, %s136_s14  ;;  %v87_v15 = vld [vmem:[#allocation0] sm:$0x1]  }
  0x18   :  { %v93_v16 = vld [vmem:[#allocation0] sm:$0x1]  }
  0x1a   :  { %58 = vrot.lane.b32.xlu0 %v57_v9, %s137_s17 }
  0x1b   :  { %64 = vrot.lane.b32.xlu1 %v63_v10, %s138_s18 }
  0x1e   :  { %70 = vrot.lane.b32.xlu0 %v69_v12, %s139_s19 }
  0x1f   :  { %76 = vrot.lane.b32.xlu1 %v75_v13, %s140_s20 }
  0x22   :  { %82 = vrot.lane.b32.xlu0 %v81_v14, %s141_s21 }
  0x23   :  { %88 = vrot.lane.b32.xlu1 %v87_v15, %s142_s22 }
  0x26   :  { %94 = vrot.lane.b32.xlu0 %v93_v16, %s143_s23 }
  0x7c   :  { %v11_v17 = vpop.permute.xlu0 %10  }
  0x7d   :  { %v23_v18 = vpop.permute.xlu1 %22   ;;  %99 = vst.msk [vmem:[%s222_s1 + $0x1] sm:$0x1] %vm7_vm0, %v11_v17  }
  0x7e   :  { %101 = vst.msk [vmem:[%s222_s1 + $0x3] sm:$0x1] %vm7_vm0, %v23_v18  }
  0x80   :  { %v17_v19 = vpop.permute.xlu0 %16  }
  0x81   :  { %v29_v20 = vpop.permute.xlu1 %28   ;;  %100 = vst.msk [vmem:[%s222_s1 + $0x2] sm:$0x1] %vm7_vm0, %v17_v19  }
  0x82   :  { %102 = vst.msk [vmem:[%s222_s1 + $0x4] sm:$0x1] %vm7_vm0, %v29_v20  }
  0x84   :  { %v35_v21 = vpop.permute.xlu0 %34  }
  0x85   :  { %v41_v22 = vpop.permute.xlu1 %40   ;;  %103 = vst.msk [vmem:[%s222_s1 + $0x5] sm:$0x1] %vm7_vm0, %v35_v21  }
  0x86   :  { %104 = vst.msk [vmem:[%s222_s1 + $0x6] sm:$0x1] %vm7_vm0, %v41_v22  }
  0x88   :  { %v47_v23 = vpop.permute.xlu0 %46  }
  0x89   :  { %v53_v24 = vpop.permute.xlu1 %52   ;;  %105 = vst.msk [vmem:[%s222_s1 + $0x7] sm:$0x1] %vm7_vm0, %v47_v23  }
  0x8a   :  { %106 = vst.msk [vmem:[%s222_s1 + $0x8] sm:$0x1] %vm7_vm0, %v53_v24  }
  0x8c   :  { %v59_v25 = vpop.permute.xlu0 %58  }
  0x8d   :  { %v65_v26 = vpop.permute.xlu1 %64   ;;  %107 = vst.msk [vmem:[%s222_s1 + $0x9] sm:$0x1] %vm7_vm0, %v59_v25  }
  0x8e   :  { %108 = vst.msk [vmem:[%s222_s1 + $0xa] sm:$0x1] %vm7_vm0, %v65_v26  }
  0x90   :  { %v71_v27 = vpop.permute.xlu0 %70  }
  0x91   :  { %v77_v28 = vpop.permute.xlu1 %76   ;;  %109 = vst.msk [vmem:[%s222_s1 + $0xb] sm:$0x1] %vm7_vm0, %v71_v27  }
  0x92   :  { %110 = vst.msk [vmem:[%s222_s1 + $0xc] sm:$0x1] %vm7_vm0, %v77_v28  }
  0x94   :  { %v83_v29 = vpop.permute.xlu0 %82  }
  0x95   :  { %v89_v30 = vpop.permute.xlu1 %88   ;;  %111 = vst.msk [vmem:[%s222_s1 + $0xd] sm:$0x1] %vm7_vm0, %v83_v29  }
  0x96   :  { %112 = vst.msk [vmem:[%s222_s1 + $0xe] sm:$0x1] %vm7_vm0, %v89_v30  }
  0x98   :  { %v95_v31 = vpop.permute.xlu0 %94  }
  0x99   :  { %113 = vst.msk [vmem:[%s222_s1 + $0xf] sm:$0x1] %vm7_vm0, %v95_v31  }

// kernel: pointnet_sa_module_votes_forward.1
= control target key start
LH: loop header
LB: loop body
LE: loop exit
PB: predicated region body
PF: predicated region fallthrough
CT: control target
= control target key end

     0   :  { %s2185_s18 = smov 0   ;;  %s2187_s19 = smov 0   ;;  %s2526_s0 = inlined_call_operand.vmem [shape: bf16[2,1,7,64], index: 0, kind: input, shape index: {}]   ;;  %s2527_s1 = inlined_call_operand.vmem [shape: bf16[128,7], index: 1, kind: input, shape index: {}]   ;;  %s2528_s2 = inlined_call_operand.vmem [shape: f32[128,1], index: 2, kind: input, shape index: {}]   ;;  %s2529_s3 = inlined_call_operand.vmem [shape: bf16[128,128], index: 3, kind: input, shape index: {}]   ;;  %s2530_s4 = inlined_call_operand.vmem [shape: f32[128,1], index: 4, kind: input, shape index: {}]   ;;  %s2531_s5 = inlined_call_operand.vmem [shape: f32[2,32,8], index: 5, kind: output, shape index: {}]  }
   0x1   :  { %s2189_s20 = smov 0  }
   0x2 LB: > { %s27_s21 = sadd.s32 1, %s2140_s19  ;;  %p1629_p0 = scmp.ge.s32.totalorder %s2144_s20, 1  ;;  %s2144_s20 = sphi %s2189_s20, %s15_s20   ;;  %s2140_s19 = sphi %s2187_s19, %s2533_s19   ;;  %s2136_s18 = sphi %s2185_s18, %s2532_s18  }
   0x3   : > { %p29_p1 = scmp.ge.s32.totalorder %s27_s21, 2  ;;  %p205_p2 = scmp.lt.s32.totalorder %s2144_s20, 3 }
   0x5   : > { %s2535_s21 = smov (%p29_p1, %s27_s21), 0  ;;  %p206_p3 = pnand %p1629_p0, %p205_p2 }
   0x6   : > { %p238_p4 = scmp.lt.s32.totalorder (!%p206_p3), %s2136_s18, 1  ;;  %vm432_vm0 = vcmask (!%p206_p3), 1042432   ;;  %vm433_vm1 = vcmask (!%p206_p3), 1043456   ;;  %v2146_v0 = vmov (!%p206_p3), 65535   ;;  %v2106_v2 = vld [vmem:[%s2527_s1] sm:$0xff] (!%p206_p3)   ;;  %vm407_vm2 = vcmask (!%p206_p3), 56320  }
   0x7   : > { %209 = sbr.rel (%p206_p3) target bundleno = 727 (0x2d7), region = 40  ;;  %v434_v1 = vsel (!%p206_p3), %vm432_vm0, 4294967295, %v2146_v0  ;;  %1799 = vmatprep.mubr.msk.bf16.mxu0 (!%p206_p3), %vm407_vm2, %v2106_v2  ;;  %v2147_v4 = vmov (!%p206_p3), 0   ;;  %v2107_v7 = vld [vmem:[%s2527_s1 + $0x8] sm:$0xff] (!%p206_p3)   ;;  %v271_v8 = vld [vmem:[%s2528_s2] sm:$0xff] (!%p206_p3)  ;;  %v2108_v9 = vld [vmem:[%s2527_s1 + $0x10] sm:$0xff] (!%p206_p3)  }
   0x8   : > { %v435_v3 = vsel (!%p206_p3), %vm433_vm1, %v434_v1, 0  ;;  %2104 = vset.pattern.permute.xlu0 (!%p206_p3), %v2147_v4  ;;  %2105 = vset.pattern.permute.xlu1 (!%p206_p3), %v2147_v4  ;;  %v273_v10 = vld [vmem:[%s2528_s2 + $0x10] sm:$0xff] (!%p206_p3)  ;;  %v272_v11 = vld [vmem:[%s2528_s2 + $0x8] sm:$0xff] (!%p206_p3)  ;;  %v274_v12 = vld [vmem:[%s2528_s2 + $0x18] sm:$0xff] (!%p206_p3)  ;;  %s2148_s7 = smov (!%p206_p3), 120   ;;  %s2149_s10 = smov (!%p206_p3), 104  }
   0x9   : > { %289 = vperm.xlu0 (!%p206_p3), %2104, %v271_v8   ;;  %299 = vperm.xlu1 (!%p206_p3), %2105, %v273_v10   ;;  %v275_v13 = vld [vmem:[%s2528_s2 + $0x20] sm:$0xff] (!%p206_p3)  ;;  %v276_v14 = vld [vmem:[%s2528_s2 + $0x28] sm:$0xff] (!%p206_p3)  ;;  %v2109_v15 = vld [vmem:[%s2527_s1 + $0x18] sm:$0xff] (!%p206_p3)   ;;  %s2150_s11 = smov (!%p206_p3), 112   ;;  %s2151_s30 = smov (!%p206_p3), 88   ;;  %vm1540_vm3 = vcmask (!%p206_p3), 64512  }
   0xa   : > { %v2110_v16 = vld [vmem:[%s2527_s1 + $0x20] sm:$0xff] (!%p206_p3)   ;;  %v277_v17 = vld [vmem:[%s2528_s2 + $0x30] sm:$0xff] (!%p206_p3)  ;;  %v278_v18 = vld [vmem:[%s2528_s2 + $0x38] sm:$0xff] (!%p206_p3)  ;;  %s2152_s6 = smov (!%p206_p3), 96   ;;  %s2154_s8 = smov (!%p206_p3), 80  }
   0xb   : > { %v279_v19 = vld [vmem:[%s2528_s2 + $0x40] sm:$0xff] (!%p206_p3)  ;;  %v280_v20 = vld [vmem:[%s2528_s2 + $0x48] sm:$0xff] (!%p206_p3)  ;;  %v2112_v22 = vld [vmem:[%s2527_s1 + $0x30] sm:$0xff] (!%p206_p3)  }
   0xc   : > { %v2111_v21 = vld [vmem:[%s2527_s1 + $0x28] sm:$0xff] (!%p206_p3)   ;;  %v281_v23 = vld [vmem:[%s2528_s2 + $0x50] sm:$0xff] (!%p206_p3)  ;;  %v282_v24 = vld [vmem:[%s2528_s2 + $0x58] sm:$0xff] (!%p206_p3) }
   0xd   : > { %294 = vperm.xlu0 (!%p206_p3), %2104, %v272_v11   ;;  %304 = vperm.xlu1 (!%p206_p3), %2105, %v274_v12   ;;  %v283_v25 = vld [vmem:[%s2528_s2 + $0x60] sm:$0xff] (!%p206_p3)  ;;  %v284_v26 = vld [vmem:[%s2528_s2 + $0x68] sm:$0xff] (!%p206_p3)  ;;  %v2113_v27 = vld [vmem:[%s2527_s1 + $0x38] sm:$0xff] (!%p206_p3)  }
   0xe   : > { %s2537_s18 = smov (!%p238_p4, %s2136_s18), 1  ;;  %v285_v28 = vld [vmem:[%s2528_s2 + $0x70] sm:$0xff]  ;;  %v286_v29 = vld [vmem:[%s2528_s2 + $0x78] sm:$0xff] }
   0xf   : > { %s1630_s24 = sshll.u32 %s2537_s18, 2  ;;  %s1659_s17 = sshll.u32 %s2537_s18, 5 }
  0x10   : > { %s244_s27 = scalar_lea.vmem %s2526_s0, %s1630_s24  ;;  %s252_s24 = scalar_lea.vmem %s2531_s5, %s1659_s17 }
  0x11   : > { %v270_v5 = vld [vmem:[%s244_s27] sm:$0xf]  ;;  %309 = vperm.xlu0 %2104, %v275_v13   ;;  %314 = vperm.xlu1 %2105, %v276_v14  }
  0x12   : > { %v437_v6 = vand.u32 %v435_v3, %v270_v5 }
  0x14   : > { %1797 = vmatprep.subr.bf16.mxu0 %v437_v6 }
  0x15   : > { %1798 = vmatpush3.bf16.msra.mxu0 %v437_v6  ;;  %319 = vperm.xlu0 %2104, %v277_v17  }
  0x16   : > { %324 = vperm.xlu1 %2105, %v278_v18  }
  0x18   : > { %1800 = vmatmul.mubr.msk.bf16.vlgmr.msra.gmra.mrb[0].mxu0 %vm407_vm2, %v2107_v7 }
  0x19   : > { %1803 = vmatprep.mubr.msk.bf16.mxu0 %vm407_vm2, %v2108_v9  ;;  %329 = vperm.xlu0 %2104, %v279_v19  }
  0x1a   : > { %334 = vperm.xlu1 %2105, %v280_v20   ;;  %v2315_v20 = vld [vmem:[%s2529_s3] sm:$0xff]  }
  0x1b   : > { %1831 = vmatprep.mubr.bf16.mxu1 %v2315_v20 }
  0x1d   : > { %339 = vperm.xlu0 %2104, %v281_v23  }
  0x1e   : > { %344 = vperm.xlu1 %2105, %v282_v24  }
  0x20   : > { %1804 = vmatmul.mubr.msk.bf16.gmra.mrb[4].mxu0 %vm407_vm2, %v2109_v15 }
  0x21   : > { %1807 = vmatprep.mubr.msk.bf16.mxu0 %vm407_vm2, %v2110_v16  ;;  %349 = vperm.xlu0 %2104, %v283_v25  }
  0x22   : > { %354 = vperm.xlu1 %2105, %v284_v26  }
  0x25   : > { %359 = vperm.xlu0 %2104, %v285_v28  }
  0x26   : > { %364 = vperm.xlu1 %2105, %v286_v29  }
  0x28   : > { %1808 = vmatmul.mubr.msk.bf16.gmra.mrb[8].mxu0 %vm407_vm2, %v2111_v21 }
  0x29   : > { %1811 = vmatprep.mubr.msk.bf16.mxu0 %vm407_vm2, %v2112_v22 }
  0x30   : > { %1812 = vmatmul.mubr.msk.bf16.gmra.mrb[12].mxu0 %vm407_vm2, %v2113_v27 }
  0x31   : > { %1863 = vmatprep.mubr.bf16.mxu0 %v2315_v20 }
  0x88   : > { %v290_v30 = vpop.permute.xlu0 %289  ;;  %v300_v31 = vpop.permute.xlu1 %299 }
  0x8c   : > { %v295_v32 = vpop.permute.xlu0 %294  ;;  %v305_v33 = vpop.permute.xlu1 %304 }
  0x90   : > { %v310_v34 = vpop.permute.xlu0 %309  ;;  %v315_v35 = vpop.permute.xlu1 %314 }
  0x94   : > { %v320_v36 = vpop.permute.xlu0 %319 }
  0x95   : > { %v325_v40 = vpop.permute.xlu1 %324 }
  0x98   : > { %v330_v48 = vpop.permute.xlu0 %329 }
  0x99   : > { %v335_v52 = vpop.permute.xlu1 %334 }
  0x9c   : > { %v340_v61 = vpop.permute.xlu0 %339 }
  0x9d   : > { %v345_v1 = vpop.permute.xlu1 %344 }
  0xa0   : > { %v350_v9 = vpop.permute.xlu0 %349 }
  0xa1   : > { %v355_v14 = vpop.permute.xlu1 %354 }
  0xa4   : > { %v360_v22 = vpop.permute.xlu0 %359 }
  0xa5   : > { %v365_v27 = vpop.permute.xlu1 %364 }
  0xeb   : > { %v1801_v37 = vpop.f32.mrb[0].mxu0 }
  0xec   : > { %v482_v38 = vadd.f32 %v1801_v37, %v300_v31  ;;  %v473_v39 = vpop.f32.mrb[1].mxu0 }
  0xed   : > { %v474_v41 = vadd.f32 %v473_v39, %v290_v30  ;;  %v1802_v42 = vpop.f32.mrb[2].mxu0  ;;  %v2349_v39 = vld [vmem:[%s2529_s3 + $0x8] sm:$0xff]  }
  0xee   : > { %v485_v43 = vadd.f32 %v1802_v42, %v305_v33  ;;  %v476_v44 = vpop.f32.mrb[3].mxu0  ;;  %v538_v46 = vmax.f32 %v482_v38, 0.0  ;;  %v2373_v42 = vld [vmem:[%s2529_s3 + $0x20] sm:$0xff]  }
  0xef   : > { %v477_v45 = vadd.f32 %v476_v44, %v295_v32  ;;  %v536_v49 = vmax.f32 %v474_v41, 0.0  ;;  %v2368_v41 = vld [vmem:[%s2529_s3 + $0x18] sm:$0xff]   ;;  %v2391_v44 = vld [vmem:[%s2529_s3 + $0x30] sm:$0xff]  }
  0xf0   : > { %v539_v47 = vmax.f32 %v485_v43, 0.0  ;;  %v2386_v43 = vld [vmem:[%s2529_s3 + $0x28] sm:$0xff]  }
  0xf1   : > { %v537_v50 = vmax.f32 %v477_v45, 0.0  ;;  %v2404_v45 = vld [vmem:[%s2529_s3 + $0x38] sm:$0xff]  }
  0xf2   : > { %v2289_v51 = vpack.c.bf16 %v539_v47, %v538_v46 }
  0xf3   : > { %v2291_v53 = vpack.c.bf16 %v537_v50, %v536_v49  ;;  %v1805_v54 = vpop.f32.mrb[4].mxu0  ;;  %v1508_v49 = vld [vmem:[%s2530_s4] sm:$0xff] }
  0xf4   : > { %v498_v55 = vadd.f32 %v1805_v54, %v320_v36  ;;  %719 = vrot.lane.b32.xlu1 %v2289_v51, %s2148_s7  ;;  %v489_v56 = vpop.f32.mrb[5].mxu0 }
  0xf5   : > { %v490_v57 = vadd.f32 %v489_v56, %v310_v34  ;;  %v1806_v58 = vpop.f32.mrb[6].mxu0  ;;  %717 = vrot.lane.b32.xlu0 %v2291_v53, %s2148_s7  ;;  %1815 = vmatprep.subr.bf16.mxu1 %v2291_v53 }
  0xf6   : > { %v501_v59 = vadd.f32 %v1806_v58, %v325_v40  ;;  %v492_v60 = vpop.f32.mrb[7].mxu0  ;;  %1816 = vmatpush3.bf16.msra.mxu1 %v2291_v53  ;;  %v542_v63 = vmax.f32 %v498_v55, 0.0  ;;  %v2355_v40 = vld [vmem:[%s2529_s3 + $0x10] sm:$0xff]  }
  0xf7   : > { %v493_v62 = vadd.f32 %v492_v60, %v315_v35  ;;  %1817 = vmatprep.subr.bf16.mxu1 %v2289_v51  ;;  %v540_v2 = vmax.f32 %v490_v57, 0.0 }
  0xf8   : > { %v543_v0 = vmax.f32 %v501_v59, 0.0 }
  0xf9   : > { %v541_v3 = vmax.f32 %v493_v62, 0.0 }
  0xfa   : > { %v2300_v4 = vpack.c.bf16 %v543_v0, %v542_v63  ;;  %1818 = vmatpush3.bf16.msra.mxu1 %v2289_v51 }
  0xfb   : > { %v2303_v5 = vpack.c.bf16 %v541_v3, %v540_v2  ;;  %v1809_v6 = vpop.f32.mrb[8].mxu0 }
  0xfc   : > { %v514_v7 = vadd.f32 %v1809_v6, %v340_v61  ;;  %723 = vrot.lane.b32.xlu1 %v2300_v4, %s2148_s7  ;;  %v505_v8 = vpop.f32.mrb[9].mxu0 }
  0xfd   : > { %v506_v10 = vadd.f32 %v505_v8, %v330_v48  ;;  %v1810_v11 = vpop.f32.mrb[10].mxu0  ;;  %721 = vrot.lane.b32.xlu0 %v2303_v5, %s2148_s7  ;;  %1819 = vmatprep.subr.bf16.mxu1 %v2303_v5  ;;  %v1509_v48 = vld [vmem:[%s2530_s4 + $0x8] sm:$0xff] }
  0xfe   : > { %v517_v12 = vadd.f32 %v1810_v11, %v345_v1  ;;  %v508_v13 = vpop.f32.mrb[11].mxu0  ;;  %1820 = vmatpush3.bf16.msra.mxu1 %v2303_v5  ;;  %v546_v16 = vmax.f32 %v514_v7, 0.0 }
  0xff   : > { %v509_v15 = vadd.f32 %v508_v13, %v335_v52  ;;  %1821 = vmatprep.subr.bf16.mxu1 %v2300_v4  ;;  %v544_v18 = vmax.f32 %v506_v10, 0.0  ;;  %v1511_v52 = vld [vmem:[%s2530_s4 + $0x18] sm:$0xff] }
 0x100   : > { %v547_v17 = vmax.f32 %v517_v12, 0.0 }
 0x101   : > { %v545_v19 = vmax.f32 %v509_v15, 0.0 }
 0x102   : > { %v2317_v21 = vpack.c.bf16 %v547_v17, %v546_v16  ;;  %1822 = vmatpush3.bf16.msra.mxu1 %v2300_v4 }
 0x103   : > { %v2320_v23 = vpack.c.bf16 %v545_v19, %v544_v18  ;;  %v1813_v24 = vpop.f32.mrb[12].mxu0 }
 0x104   : > { %v530_v25 = vadd.f32 %v1813_v24, %v360_v22  ;;  %727 = vrot.lane.b32.xlu1 %v2317_v21, %s2148_s7  ;;  %v521_v26 = vpop.f32.mrb[13].mxu0 }
 0x105   : > { %v522_v28 = vadd.f32 %v521_v26, %v350_v9  ;;  %v1814_v29 = vpop.f32.mrb[14].mxu0  ;;  %725 = vrot.lane.b32.xlu0 %v2320_v23, %s2148_s7  ;;  %1823 = vmatprep.subr.bf16.mxu1 %v2320_v23 }
 0x106   : > { %v533_v30 = vadd.f32 %v1814_v29, %v365_v27  ;;  %v524_v31 = vpop.f32.mrb[15].mxu0  ;;  %1824 = vmatpush3.bf16.msra.mxu1 %v2320_v23  ;;  %v550_v33 = vmax.f32 %v530_v25, 0.0 }
 0x107   : > { %v525_v32 = vadd.f32 %v524_v31, %v355_v14  ;;  %1825 = vmatprep.subr.bf16.mxu1 %v2317_v21  ;;  %v548_v35 = vmax.f32 %v522_v28, 0.0 }
 0x108   : > { %v551_v34 = vmax.f32 %v533_v30, 0.0 }
 0x109   : > { %v549_v36 = vmax.f32 %v525_v32, 0.0 }
 0x10a   : > { %v2331_v37 = vpack.c.bf16 %v551_v34, %v550_v33  ;;  %1826 = vmatpush3.bf16.msra.mxu1 %v2317_v21 }
 0x10b   : > { %v2334_v38 = vpack.c.bf16 %v549_v36, %v548_v35 }
 0x10c   : > { %731 = vrot.lane.b32.xlu1 %v2331_v37, %s2148_s7 }
 0x10d   : > { %729 = vrot.lane.b32.xlu0 %v2334_v38, %s2148_s7  ;;  %1827 = vmatprep.subr.bf16.mxu1 %v2334_v38  ;;  %s2153_s7 = smov 72  }
 0x10e   : > { %1828 = vmatpush3.bf16.msra.mxu1 %v2334_v38 }
 0x10f   : > { %1829 = vmatprep.subr.bf16.mxu1 %v2331_v37 }
 0x110   : > { %943 = vrot.lane.b32.xlu1 %v2291_v53, %s2149_s10 }
 0x111   : > { %830 = vrot.lane.b32.xlu0 %v2291_v53, %s2150_s11 }
 0x112   : > { %1830 = vmatpush3.bf16.msra.mxu1 %v2331_v37 }
 0x114   : > { %945 = vrot.lane.b32.xlu1 %v2289_v51, %s2149_s10 }
 0x115   : > { %832 = vrot.lane.b32.xlu0 %v2289_v51, %s2150_s11  ;;  %1832 = vmatmul.mubr.bf16.vlgmr.msra.gmra.mrb[0].mxu1 %v2349_v39 }
 0x116   : > { %1835 = vmatprep.mubr.bf16.mxu1 %v2355_v40 }
 0x118   : > { %947 = vrot.lane.b32.xlu1 %v2303_v5, %s2149_s10 }
 0x119   : > { %834 = vrot.lane.b32.xlu0 %v2303_v5, %s2150_s11 }
 0x11c   : > { %949 = vrot.lane.b32.xlu1 %v2300_v4, %s2149_s10 }
 0x11d   : > { %836 = vrot.lane.b32.xlu0 %v2300_v4, %s2150_s11  ;;  %1836 = vmatmul.mubr.bf16.gmra.mrb[4].mxu1 %v2368_v41 }
 0x11e   : > { %1839 = vmatprep.mubr.bf16.mxu1 %v2373_v42 }
 0x120   : > { %951 = vrot.lane.b32.xlu1 %v2320_v23, %s2149_s10 }
 0x121   : > { %838 = vrot.lane.b32.xlu0 %v2320_v23, %s2150_s11 }
 0x124   : > { %953 = vrot.lane.b32.xlu1 %v2317_v21, %s2149_s10 }
 0x125   : > { %840 = vrot.lane.b32.xlu0 %v2317_v21, %s2150_s11  ;;  %1840 = vmatmul.mubr.bf16.gmra.mrb[8].mxu1 %v2386_v43 }
 0x126   : > { %1843 = vmatprep.mubr.bf16.mxu1 %v2391_v44 }
 0x128   : > { %955 = vrot.lane.b32.xlu1 %v2334_v38, %s2149_s10 }
 0x129   : > { %842 = vrot.lane.b32.xlu0 %v2334_v38, %s2150_s11 }
 0x12c   : > { %957 = vrot.lane.b32.xlu1 %v2331_v37, %s2149_s10 }
 0x12d   : > { %844 = vrot.lane.b32.xlu0 %v2331_v37, %s2150_s11  ;;  %1844 = vmatmul.mubr.bf16.gmra.mrb[12].mxu1 %v2404_v45 }
 0x12e   : > { %1895 = vmatprep.mubr.bf16.mxu1 %v2315_v20 }
 0x130   : > { %1169 = vrot.lane.b32.xlu1 %v2291_v53, %s2151_s30 }
 0x131   : > { %1056 = vrot.lane.b32.xlu0 %v2291_v53, %s2152_s6 }
 0x134   : > { %1171 = vrot.lane.b32.xlu1 %v2289_v51, %s2151_s30 }
 0x135   : > { %1058 = vrot.lane.b32.xlu0 %v2289_v51, %s2152_s6 }
 0x138   : > { %1173 = vrot.lane.b32.xlu1 %v2303_v5, %s2151_s30 }
 0x139   : > { %1060 = vrot.lane.b32.xlu0 %v2303_v5, %s2152_s6 }
 0x13c   : > { %1175 = vrot.lane.b32.xlu1 %v2300_v4, %s2151_s30 }
 0x13d   : > { %1062 = vrot.lane.b32.xlu0 %v2300_v4, %s2152_s6 }
 0x140   : > { %1177 = vrot.lane.b32.xlu1 %v2320_v23, %s2151_s30 }
 0x141   : > { %1064 = vrot.lane.b32.xlu0 %v2320_v23, %s2152_s6 }
 0x144   : > { %1179 = vrot.lane.b32.xlu1 %v2317_v21, %s2151_s30 }
 0x145   : > { %1066 = vrot.lane.b32.xlu0 %v2317_v21, %s2152_s6 }
 0x148   : > { %1181 = vrot.lane.b32.xlu1 %v2334_v38, %s2151_s30 }
 0x149   : > { %1068 = vrot.lane.b32.xlu0 %v2334_v38, %s2152_s6 }
 0x14c   : > { %1183 = vrot.lane.b32.xlu1 %v2331_v37, %s2151_s30 }
 0x14d   : > { %1070 = vrot.lane.b32.xlu0 %v2331_v37, %s2152_s6 }
 0x150   : > { %1395 = vrot.lane.b32.xlu1 %v2291_v53, %s2153_s7 }
 0x151   : > { %1282 = vrot.lane.b32.xlu0 %v2291_v53, %s2154_s8  ;;  %v1510_v53 = vld [vmem:[%s2530_s4 + $0x10] sm:$0xff] }
 0x154   : > { %1397 = vrot.lane.b32.xlu1 %v2289_v51, %s2153_s7 }
 0x155   : > { %1284 = vrot.lane.b32.xlu0 %v2289_v51, %s2154_s8 }
 0x158   : > { %1399 = vrot.lane.b32.xlu1 %v2303_v5, %s2153_s7 }
 0x159   : > { %1286 = vrot.lane.b32.xlu0 %v2303_v5, %s2154_s8 }
 0x15c   : > { %1401 = vrot.lane.b32.xlu1 %v2300_v4, %s2153_s7 }
 0x15d   : > { %1288 = vrot.lane.b32.xlu0 %v2300_v4, %s2154_s8 }
 0x160   : > { %1403 = vrot.lane.b32.xlu1 %v2320_v23, %s2153_s7 }
 0x161   : > { %1290 = vrot.lane.b32.xlu0 %v2320_v23, %s2154_s8 }
 0x164   : > { %1405 = vrot.lane.b32.xlu1 %v2317_v21, %s2153_s7 }
 0x165   : > { %1292 = vrot.lane.b32.xlu0 %v2317_v21, %s2154_s8 }
 0x166   : > { %v720_v47 = vpop.permute.xlu1 %719 }
 0x167   : > { %v718_v46 = vpop.permute.xlu0 %717 }
 0x168   : > { %1407 = vrot.lane.b32.xlu1 %v2334_v38, %s2153_s7  ;;  %1847 = vmatprep.subr.bf16.mxu0 %v718_v46 }
 0x169   : > { %1294 = vrot.lane.b32.xlu0 %v2334_v38, %s2154_s8  ;;  %1848 = vmatpush3.bf16.msra.mxu0 %v718_v46 }
 0x16a   : > { %1849 = vmatprep.subr.bf16.mxu0 %v720_v47 }
 0x16c   : > { %1409 = vrot.lane.b32.xlu1 %v2331_v37, %s2153_s7 }
 0x16d   : > { %1296 = vrot.lane.b32.xlu0 %v2331_v37, %s2154_s8  ;;  %1850 = vmatpush3.bf16.msra.mxu0 %v720_v47 }
 0x16e   : > { %v724_v51 = vpop.permute.xlu1 %723 }
 0x16f   : > { %v722_v50 = vpop.permute.xlu0 %721 }
 0x170   : > { %1519 = vperm.xlu1 %2105, %v1509_v48   ;;  %1851 = vmatprep.subr.bf16.mxu0 %v722_v50 }
 0x171   : > { %1514 = vperm.xlu0 %2104, %v1508_v49   ;;  %1852 = vmatpush3.bf16.msra.mxu0 %v722_v50 }
 0x172   : > { %1853 = vmatprep.subr.bf16.mxu0 %v724_v51 }
 0x174   : > { %1529 = vperm.xlu1 %2105, %v1511_v52  }
 0x175   : > { %1524 = vperm.xlu0 %2104, %v1510_v53   ;;  %1854 = vmatpush3.bf16.msra.mxu0 %v724_v51 }
 0x176   : > { %v728_v55 = vpop.permute.xlu1 %727 }
 0x177   : > { %v726_v54 = vpop.permute.xlu0 %725 }
 0x178   : > { %1855 = vmatprep.subr.bf16.mxu0 %v726_v54 }
 0x179   : > { %1856 = vmatpush3.bf16.msra.mxu0 %v726_v54 }
 0x17a   : > { %1857 = vmatprep.subr.bf16.mxu0 %v728_v55 }
 0x17d   : > { %1858 = vmatpush3.bf16.msra.mxu0 %v728_v55 }
 0x17e   : > { %v732_v56 = vpop.permute.xlu1 %731 }
 0x17f   : > { %v730_v57 = vpop.permute.xlu0 %729 }
 0x180   : > { %1859 = vmatprep.subr.bf16.mxu0 %v730_v57 }
 0x181   : > { %1860 = vmatpush3.bf16.msra.mxu0 %v730_v57 }
 0x182   : > { %v944_v58 = vpop.permute.xlu1 %943  ;;  %1861 = vmatprep.subr.bf16.mxu0 %v732_v56 }
 0x183   : > { %v831_v59 = vpop.permute.xlu0 %830 }
 0x184   : > { %1879 = vmatprep.subr.bf16.mxu1 %v831_v59 }
 0x185   : > { %1862 = vmatpush3.bf16.msra.mxu0 %v732_v56  ;;  %1880 = vmatpush3.bf16.msra.mxu1 %v831_v59 }
 0x186   : > { %v946_v60 = vpop.permute.xlu1 %945  ;;  %1911 = vmatprep.subr.bf16.mxu0 %v944_v58 }
 0x187   : > { %v833_v61 = vpop.permute.xlu0 %832 }
 0x188   : > { %1864 = vmatmul.mubr.bf16.vlgmr.msra.gmra.mrb[16].mxu0 %v2349_v39  ;;  %1881 = vmatprep.subr.bf16.mxu1 %v833_v61 }
 0x189   : > { %1882 = vmatpush3.bf16.msra.mxu1 %v833_v61  ;;  %1912 = vmatpush3.bf16.msra.mxu0 %v944_v58 }
 0x18a   : > { %v948_v62 = vpop.permute.xlu1 %947  ;;  %1913 = vmatprep.subr.bf16.mxu0 %v946_v60  ;;  %1867 = vmatprep.mubr.bf16.mxu0 %v2355_v40 }
 0x18b   : > { %v835_v63 = vpop.permute.xlu0 %834 }
 0x18c   : > { %1883 = vmatprep.subr.bf16.mxu1 %v835_v63 }
 0x18d   : > { %1884 = vmatpush3.bf16.msra.mxu1 %v835_v63  ;;  %1914 = vmatpush3.bf16.msra.mxu0 %v946_v60 }
 0x18e   : > { %v950_v0 = vpop.permute.xlu1 %949  ;;  %1915 = vmatprep.subr.bf16.mxu0 %v948_v62 }
 0x18f   : > { %v837_v1 = vpop.permute.xlu0 %836 }
 0x190   : > { %1868 = vmatmul.mubr.bf16.gmra.mrb[20].mxu0 %v2368_v41  ;;  %1885 = vmatprep.subr.bf16.mxu1 %v837_v1 }
 0x191   : > { %1886 = vmatpush3.bf16.msra.mxu1 %v837_v1  ;;  %1916 = vmatpush3.bf16.msra.mxu0 %v948_v62 }
 0x192   : > { %v952_v2 = vpop.permute.xlu1 %951  ;;  %1917 = vmatprep.subr.bf16.mxu0 %v950_v0  ;;  %1871 = vmatprep.mubr.bf16.mxu0 %v2373_v42 }
 0x193   : > { %v839_v3 = vpop.permute.xlu0 %838 }
 0x194   : > { %1887 = vmatprep.subr.bf16.mxu1 %v839_v3 }
 0x195   : > { %1888 = vmatpush3.bf16.msra.mxu1 %v839_v3  ;;  %1918 = vmatpush3.bf16.msra.mxu0 %v950_v0 }
 0x196   : > { %v954_v4 = vpop.permute.xlu1 %953  ;;  %1919 = vmatprep.subr.bf16.mxu0 %v952_v2 }
 0x197   : > { %v841_v5 = vpop.permute.xlu0 %840 }
 0x198   : > { %1872 = vmatmul.mubr.bf16.gmra.mrb[24].mxu0 %v2386_v43  ;;  %1889 = vmatprep.subr.bf16.mxu1 %v841_v5 }
 0x199   : > { %1890 = vmatpush3.bf16.msra.mxu1 %v841_v5  ;;  %1920 = vmatpush3.bf16.msra.mxu0 %v952_v2 }
 0x19a   : > { %v956_v6 = vpop.permute.xlu1 %955  ;;  %1921 = vmatprep.subr.bf16.mxu0 %v954_v4  ;;  %1875 = vmatprep.mubr.bf16.mxu0 %v2391_v44 }
 0x19b   : > { %v843_v7 = vpop.permute.xlu0 %842 }
 0x19c   : > { %1891 = vmatprep.subr.bf16.mxu1 %v843_v7 }
 0x19d   : > { %1892 = vmatpush3.bf16.msra.mxu1 %v843_v7  ;;  %1922 = vmatpush3.bf16.msra.mxu0 %v954_v4 }
 0x19e   : > { %v958_v8 = vpop.permute.xlu1 %957  ;;  %1923 = vmatprep.subr.bf16.mxu0 %v956_v6 }
 0x19f   : > { %v845_v9 = vpop.permute.xlu0 %844 }
 0x1a0   : > { %1876 = vmatmul.mubr.bf16.gmra.mrb[28].mxu0 %v2404_v45  ;;  %1893 = vmatprep.subr.bf16.mxu1 %v845_v9 }
 0x1a1   : > { %1894 = vmatpush3.bf16.msra.mxu1 %v845_v9  ;;  %1924 = vmatpush3.bf16.msra.mxu0 %v956_v6 }
 0x1a2   : > { %v1170_v10 = vpop.permute.xlu1 %1169  ;;  %1925 = vmatprep.subr.bf16.mxu0 %v958_v8  ;;  %1927 = vmatprep.mubr.bf16.mxu0 %v2315_v20 }
 0x1a3   : > { %v1057_v11 = vpop.permute.xlu0 %1056 }
 0x1a4   : > { %1896 = vmatmul.mubr.bf16.vlgmr.msra.gmra.mrb[16].mxu1 %v2349_v39  ;;  %1943 = vmatprep.subr.bf16.mxu1 %v1057_v11 }
 0x1a5   : > { %1926 = vmatpush3.bf16.msra.mxu0 %v958_v8  ;;  %1944 = vmatpush3.bf16.msra.mxu1 %v1057_v11 }
 0x1a6   : > { %v1172_v12 = vpop.permute.xlu1 %1171  ;;  %1975 = vmatprep.subr.bf16.mxu0 %v1170_v10  ;;  %1899 = vmatprep.mubr.bf16.mxu1 %v2355_v40 }
 0x1a7   : > { %v1059_v13 = vpop.permute.xlu0 %1058 }
 0x1a8   : > { %1928 = vmatmul.mubr.bf16.vlgmr.msra.gmra.mrb[32].mxu0 %v2349_v39  ;;  %1945 = vmatprep.subr.bf16.mxu1 %v1059_v13 }
 0x1a9   : > { %1946 = vmatpush3.bf16.msra.mxu1 %v1059_v13  ;;  %1976 = vmatpush3.bf16.msra.mxu0 %v1170_v10 }
 0x1aa   : > { %v1174_v14 = vpop.permute.xlu1 %1173  ;;  %1977 = vmatprep.subr.bf16.mxu0 %v1172_v12  ;;  %1931 = vmatprep.mubr.bf16.mxu0 %v2355_v40 }
 0x1ab   : > { %v1061_v15 = vpop.permute.xlu0 %1060 }
 0x1ac   : > { %1900 = vmatmul.mubr.bf16.gmra.mrb[20].mxu1 %v2368_v41  ;;  %1947 = vmatprep.subr.bf16.mxu1 %v1061_v15 }
 0x1ad   : > { %1948 = vmatpush3.bf16.msra.mxu1 %v1061_v15  ;;  %1978 = vmatpush3.bf16.msra.mxu0 %v1172_v12 }
 0x1ae   : > { %v1176_v16 = vpop.permute.xlu1 %1175  ;;  %1979 = vmatprep.subr.bf16.mxu0 %v1174_v14  ;;  %1903 = vmatprep.mubr.bf16.mxu1 %v2373_v42 }
 0x1af   : > { %v1063_v17 = vpop.permute.xlu0 %1062 }
 0x1b0   : > { %1932 = vmatmul.mubr.bf16.gmra.mrb[36].mxu0 %v2368_v41  ;;  %1949 = vmatprep.subr.bf16.mxu1 %v1063_v17 }
 0x1b1   : > { %1950 = vmatpush3.bf16.msra.mxu1 %v1063_v17  ;;  %1980 = vmatpush3.bf16.msra.mxu0 %v1174_v14 }
 0x1b2   : > { %v1178_v18 = vpop.permute.xlu1 %1177  ;;  %1981 = vmatprep.subr.bf16.mxu0 %v1176_v16  ;;  %1935 = vmatprep.mubr.bf16.mxu0 %v2373_v42 }
 0x1b3   : > { %v1065_v19 = vpop.permute.xlu0 %1064 }
 0x1b4   : > { %1904 = vmatmul.mubr.bf16.gmra.mrb[24].mxu1 %v2386_v43  ;;  %1951 = vmatprep.subr.bf16.mxu1 %v1065_v19 }
 0x1b5   : > { %1952 = vmatpush3.bf16.msra.mxu1 %v1065_v19  ;;  %1982 = vmatpush3.bf16.msra.mxu0 %v1176_v16 }
 0x1b6   : > { %v1180_v21 = vpop.permute.xlu1 %1179  ;;  %1983 = vmatprep.subr.bf16.mxu0 %v1178_v18  ;;  %1907 = vmatprep.mubr.bf16.mxu1 %v2391_v44 }
 0x1b7   : > { %v1067_v22 = vpop.permute.xlu0 %1066 }
 0x1b8   : > { %1936 = vmatmul.mubr.bf16.gmra.mrb[40].mxu0 %v2386_v43  ;;  %1953 = vmatprep.subr.bf16.mxu1 %v1067_v22 }
 0x1b9   : > { %1954 = vmatpush3.bf16.msra.mxu1 %v1067_v22  ;;  %1984 = vmatpush3.bf16.msra.mxu0 %v1178_v18 }
 0x1ba   : > { %v1182_v23 = vpop.permute.xlu1 %1181  ;;  %1985 = vmatprep.subr.bf16.mxu0 %v1180_v21  ;;  %1939 = vmatprep.mubr.bf16.mxu0 %v2391_v44 }
 0x1bb   : > { %v1069_v24 = vpop.permute.xlu0 %1068 }
 0x1bc   : > { %1908 = vmatmul.mubr.bf16.gmra.mrb[28].mxu1 %v2404_v45  ;;  %1955 = vmatprep.subr.bf16.mxu1 %v1069_v24 }
 0x1bd   : > { %1956 = vmatpush3.bf16.msra.mxu1 %v1069_v24  ;;  %1986 = vmatpush3.bf16.msra.mxu0 %v1180_v21 }
 0x1be   : > { %v1184_v25 = vpop.permute.xlu1 %1183  ;;  %1987 = vmatprep.subr.bf16.mxu0 %v1182_v23  ;;  %1959 = vmatprep.mubr.bf16.mxu1 %v2315_v20 }
 0x1bf   : > { %v1071_v26 = vpop.permute.xlu0 %1070 }
 0x1c0   : > { %1940 = vmatmul.mubr.bf16.gmra.mrb[44].mxu0 %v2404_v45  ;;  %1957 = vmatprep.subr.bf16.mxu1 %v1071_v26 }
 0x1c1   : > { %1958 = vmatpush3.bf16.msra.mxu1 %v1071_v26  ;;  %1988 = vmatpush3.bf16.msra.mxu0 %v1182_v23 }
 0x1c2   : > { %v1396_v27 = vpop.permute.xlu1 %1395  ;;  %1989 = vmatprep.subr.bf16.mxu0 %v1184_v25  ;;  %1991 = vmatprep.mubr.bf16.mxu0 %v2315_v20 }
 0x1c3   : > { %v1283_v28 = vpop.permute.xlu0 %1282 }
 0x1c4   : > { %1960 = vmatmul.mubr.bf16.vlgmr.msra.gmra.mrb[32].mxu1 %v2349_v39  ;;  %2007 = vmatprep.subr.bf16.mxu1 %v1283_v28 }
 0x1c5   : > { %1990 = vmatpush3.bf16.msra.mxu0 %v1184_v25  ;;  %2008 = vmatpush3.bf16.msra.mxu1 %v1283_v28 }
 0x1c6   : > { %v1398_v29 = vpop.permute.xlu1 %1397  ;;  %2039 = vmatprep.subr.bf16.mxu0 %v1396_v27  ;;  %1963 = vmatprep.mubr.bf16.mxu1 %v2355_v40 }
 0x1c7   : > { %v1285_v30 = vpop.permute.xlu0 %1284 }
 0x1c8   : > { %1992 = vmatmul.mubr.bf16.vlgmr.msra.gmra.mrb[48].mxu0 %v2349_v39  ;;  %2009 = vmatprep.subr.bf16.mxu1 %v1285_v30 }
 0x1c9   : > { %2010 = vmatpush3.bf16.msra.mxu1 %v1285_v30  ;;  %2040 = vmatpush3.bf16.msra.mxu0 %v1396_v27 }
 0x1ca   : > { %v1400_v31 = vpop.permute.xlu1 %1399  ;;  %2041 = vmatprep.subr.bf16.mxu0 %v1398_v29  ;;  %1995 = vmatprep.mubr.bf16.mxu0 %v2355_v40 }
 0x1cb   : > { %v1287_v32 = vpop.permute.xlu0 %1286 }
 0x1cc   : > { %1964 = vmatmul.mubr.bf16.gmra.mrb[36].mxu1 %v2368_v41  ;;  %2011 = vmatprep.subr.bf16.mxu1 %v1287_v32 }
 0x1cd   : > { %2012 = vmatpush3.bf16.msra.mxu1 %v1287_v32  ;;  %2042 = vmatpush3.bf16.msra.mxu0 %v1398_v29 }
 0x1ce   : > { %v1402_v33 = vpop.permute.xlu1 %1401  ;;  %2043 = vmatprep.subr.bf16.mxu0 %v1400_v31  ;;  %1967 = vmatprep.mubr.bf16.mxu1 %v2373_v42 }
 0x1cf   : > { %v1289_v34 = vpop.permute.xlu0 %1288 }
 0x1d0   : > { %1996 = vmatmul.mubr.bf16.gmra.mrb[52].mxu0 %v2368_v41  ;;  %2013 = vmatprep.subr.bf16.mxu1 %v1289_v34 }
 0x1d1   : > { %2014 = vmatpush3.bf16.msra.mxu1 %v1289_v34  ;;  %2044 = vmatpush3.bf16.msra.mxu0 %v1400_v31 }
 0x1d2   : > { %v1404_v35 = vpop.permute.xlu1 %1403  ;;  %2045 = vmatprep.subr.bf16.mxu0 %v1402_v33  ;;  %1999 = vmatprep.mubr.bf16.mxu0 %v2373_v42 }
 0x1d3   : > { %v1291_v36 = vpop.permute.xlu0 %1290 }
 0x1d4   : > { %1968 = vmatmul.mubr.bf16.gmra.mrb[40].mxu1 %v2386_v43  ;;  %2015 = vmatprep.subr.bf16.mxu1 %v1291_v36 }
 0x1d5   : > { %2016 = vmatpush3.bf16.msra.mxu1 %v1291_v36  ;;  %2046 = vmatpush3.bf16.msra.mxu0 %v1402_v33 }
 0x1d6   : > { %v1406_v37 = vpop.permute.xlu1 %1405  ;;  %2047 = vmatprep.subr.bf16.mxu0 %v1404_v35  ;;  %1971 = vmatprep.mubr.bf16.mxu1 %v2391_v44 }
 0x1d7   : > { %v1293_v38 = vpop.permute.xlu0 %1292 }
 0x1d8   : > { %2000 = vmatmul.mubr.bf16.gmra.mrb[56].mxu0 %v2386_v43  ;;  %2017 = vmatprep.subr.bf16.mxu1 %v1293_v38 }
 0x1d9   : > { %2018 = vmatpush3.bf16.msra.mxu1 %v1293_v38  ;;  %2048 = vmatpush3.bf16.msra.mxu0 %v1404_v35 }
 0x1da   : > { %2049 = vmatprep.subr.bf16.mxu0 %v1406_v37  ;;  %2003 = vmatprep.mubr.bf16.mxu0 %v2391_v44  ;;  %v1408_v46 = vpop.permute.xlu1 %1407 }
 0x1db   : > { %v1295_v47 = vpop.permute.xlu0 %1294 }
 0x1dc   : > { %1972 = vmatmul.mubr.bf16.gmra.mrb[44].mxu1 %v2404_v45  ;;  %2019 = vmatprep.subr.bf16.mxu1 %v1295_v47 }
 0x1dd   : > { %2020 = vmatpush3.bf16.msra.mxu1 %v1295_v47  ;;  %2050 = vmatpush3.bf16.msra.mxu0 %v1406_v37 }
 0x1de   : > { %2051 = vmatprep.subr.bf16.mxu0 %v1408_v46  ;;  %2023 = vmatprep.mubr.bf16.mxu1 %v2315_v20  ;;  %v1410_v49 = vpop.permute.xlu1 %1409 }
 0x1df   : > { %v1297_v48 = vpop.permute.xlu0 %1296 }
 0x1e0   : > { %2004 = vmatmul.mubr.bf16.gmra.mrb[60].mxu0 %v2404_v45  ;;  %2021 = vmatprep.subr.bf16.mxu1 %v1297_v48 }
 0x1e1   : > { %2022 = vmatpush3.bf16.msra.mxu1 %v1297_v48  ;;  %2052 = vmatpush3.bf16.msra.mxu0 %v1408_v46 }
 0x1e2   : > { %2053 = vmatprep.subr.bf16.mxu0 %v1410_v49  ;;  %2055 = vmatprep.mubr.bf16.mxu0 %v2315_v20 }
 0x1e4   : > { %2024 = vmatmul.mubr.bf16.vlgmr.msra.gmra.mrb[48].mxu1 %v2349_v39 }
 0x1e5   : > { %2054 = vmatpush3.bf16.msra.mxu0 %v1410_v49  ;;  %2027 = vmatprep.mubr.bf16.mxu1 %v2355_v40 }
 0x1e8   : > { %2056 = vmatmul.mubr.bf16.vlgmr.msra.gmra.mrb[64].mxu0 %v2349_v39  ;;  %v1833_v50 = vpop.f32.mrb[0].mxu1 }
 0x1e9   : > { %2059 = vmatprep.mubr.bf16.mxu0 %v2355_v40  ;;  %v658_v51 = vpop.f32.mrb[1].mxu1 }
 0x1ea   : > { %v1834_v52 = vpop.f32.mrb[2].mxu1 }
 0x1eb   : > { %v661_v53 = vpop.f32.mrb[3].mxu1 }
 0x1ec   : > { %2028 = vmatmul.mubr.bf16.gmra.mrb[52].mxu1 %v2368_v41 }
 0x1ed   : > { %2031 = vmatprep.mubr.bf16.mxu1 %v2373_v42 }
 0x1f0   : > { %2060 = vmatmul.mubr.bf16.gmra.mrb[68].mxu0 %v2368_v41  ;;  %v1837_v20 = vpop.f32.mrb[4].mxu1 }
 0x1f1   : > { %2063 = vmatprep.mubr.bf16.mxu0 %v2373_v42  ;;  %v674_v54 = vpop.f32.mrb[5].mxu1 }
 0x1f2   : > { %v1838_v55 = vpop.f32.mrb[6].mxu1 }
 0x1f3   : > { %v676_v56 = vpop.f32.mrb[7].mxu1 }
 0x1f4   : > { %2032 = vmatmul.mubr.bf16.gmra.mrb[56].mxu1 %v2386_v43 }
 0x1f5   : > { %2035 = vmatprep.mubr.bf16.mxu1 %v2391_v44 }
 0x1f8   : > { %2064 = vmatmul.mubr.bf16.gmra.mrb[72].mxu0 %v2386_v43  ;;  %v1841_v39 = vpop.f32.mrb[8].mxu1 }
 0x1f9   : > { %2067 = vmatprep.mubr.bf16.mxu0 %v2391_v44  ;;  %v686_v40 = vpop.f32.mrb[9].mxu1 }
 0x1fa   : > { %v1842_v57 = vpop.f32.mrb[10].mxu1 }
 0x1fb   : > { %v688_v58 = vpop.f32.mrb[11].mxu1 }
 0x1fc   : > { %2036 = vmatmul.mubr.bf16.gmra.mrb[60].mxu1 %v2404_v45 }
 0x200   : > { %2068 = vmatmul.mubr.bf16.gmra.mrb[76].mxu0 %v2404_v45  ;;  %v1845_v41 = vpop.f32.mrb[12].mxu1 }
 0x201   : > { %v698_v42 = vpop.f32.mrb[13].mxu1 }
 0x202   : > { %v1846_v59 = vpop.f32.mrb[14].mxu1 }
 0x203   : > { %v700_v60 = vpop.f32.mrb[15].mxu1 }
 0x25b   : > { %v1865_v61 = vpop.f32.mrb[16].mxu0 }
 0x25c   : > { %v828_v62 = vmax.f32 %v1833_v50, %v1865_v61  ;;  %v775_v63 = vpop.f32.mrb[17].mxu0 }
 0x25d   : > { %v826_v0 = vmax.f32 %v658_v51, %v775_v63  ;;  %v1866_v1 = vpop.f32.mrb[18].mxu0 }
 0x25e   : > { %v829_v43 = vmax.f32 %v1834_v52, %v1866_v1  ;;  %v778_v2 = vpop.f32.mrb[19].mxu0 }
 0x25f   : > { %v827_v3 = vmax.f32 %v661_v53, %v778_v2 }
 0x263   : > { %v1869_v44 = vpop.f32.mrb[20].mxu0 }
 0x264   : > { %v791_v4 = vpop.f32.mrb[21].mxu0 }
 0x265   : > { %v1870_v5 = vpop.f32.mrb[22].mxu0 }
 0x266   : > { %v793_v6 = vpop.f32.mrb[23].mxu0 }
 0x26b   : > { %v1873_v7 = vpop.f32.mrb[24].mxu0 }
 0x26c   : > { %v803_v8 = vpop.f32.mrb[25].mxu0 }
 0x26d   : > { %v1874_v9 = vpop.f32.mrb[26].mxu0 }
 0x26e   : > { %v805_v45 = vpop.f32.mrb[27].mxu0 }
 0x273   : > { %v1877_v10 = vpop.f32.mrb[28].mxu0 }
 0x274   : > { %v815_v11 = vpop.f32.mrb[29].mxu0 }
 0x275   : > { %v1878_v12 = vpop.f32.mrb[30].mxu0 }
 0x276   : > { %v817_v13 = vpop.f32.mrb[31].mxu0 }
 0x277   : > { %v1897_v14 = vpop.f32.mrb[16].mxu1 }
 0x278   : > { %v941_v15 = vmax.f32 %v828_v62, %v1897_v14  ;;  %v888_v16 = vpop.f32.mrb[17].mxu1 }
 0x279   : > { %v939_v17 = vmax.f32 %v826_v0, %v888_v16  ;;  %v1898_v18 = vpop.f32.mrb[18].mxu1 }
 0x27a   : > { %v942_v19 = vmax.f32 %v829_v43, %v1898_v18  ;;  %v891_v21 = vpop.f32.mrb[19].mxu1 }
 0x27b   : > { %v940_v22 = vmax.f32 %v827_v3, %v891_v21  ;;  %v1929_v23 = vpop.f32.mrb[32].mxu0 }
 0x27c   : > { %v1054_v24 = vmax.f32 %v941_v15, %v1929_v23  ;;  %v1001_v25 = vpop.f32.mrb[33].mxu0 }
 0x27d   : > { %v1052_v26 = vmax.f32 %v939_v17, %v1001_v25  ;;  %v1930_v27 = vpop.f32.mrb[34].mxu0 }
 0x27e   : > { %v1055_v28 = vmax.f32 %v942_v19, %v1930_v27  ;;  %v1004_v29 = vpop.f32.mrb[35].mxu0 }
 0x27f   : > { %v1053_v30 = vmax.f32 %v940_v22, %v1004_v29  ;;  %v1901_v31 = vpop.f32.mrb[20].mxu1 }
 0x280   : > { %v904_v32 = vpop.f32.mrb[21].mxu1  ;;  %v1515_v31 = vpop.permute.xlu0 %1514 }
 0x281   : > { %v1902_v33 = vpop.f32.mrb[22].mxu1 }
 0x282   : > { %v906_v34 = vpop.f32.mrb[23].mxu1 }
 0x283   : > { %v1933_v35 = vpop.f32.mrb[36].mxu0 }
 0x284   : > { %v1017_v36 = vpop.f32.mrb[37].mxu0  ;;  %v1520_v35 = vpop.permute.xlu1 %1519 }
 0x285   : > { %v1934_v37 = vpop.f32.mrb[38].mxu0 }
 0x286   : > { %v1019_v38 = vpop.f32.mrb[39].mxu0 }
 0x287   : > { %v1905_v46 = vpop.f32.mrb[24].mxu1 }
 0x288   : > { %v916_v47 = vpop.f32.mrb[25].mxu1 }
 0x289   : > { %v1906_v48 = vpop.f32.mrb[26].mxu1 }
 0x28a   : > { %v918_v49 = vpop.f32.mrb[27].mxu1 }
 0x28b   : > { %v1937_v50 = vpop.f32.mrb[40].mxu0 }
 0x28c   : > { %v1029_v51 = vpop.f32.mrb[41].mxu0 }
 0x28d   : > { %v1938_v52 = vpop.f32.mrb[42].mxu0  ;;  %v1525_v51 = vpop.permute.xlu0 %1524 }
 0x28e   : > { %v1031_v53 = vpop.f32.mrb[43].mxu0 }
 0x28f   : > { %v1909_v20 = vpop.f32.mrb[28].mxu1 }
 0x290   : > { %v928_v54 = vpop.f32.mrb[29].mxu1 }
 0x291   : > { %v1910_v55 = vpop.f32.mrb[30].mxu1 }
 0x292   : > { %v930_v56 = vpop.f32.mrb[31].mxu1 }
 0x293   : > { %v1941_v39 = vpop.f32.mrb[44].mxu0  ;;  %v1530_v56 = vpop.permute.xlu1 %1529 }
 0x294   : > { %v1041_v40 = vpop.f32.mrb[45].mxu0 }
 0x295   : > { %v1942_v57 = vpop.f32.mrb[46].mxu0 }
 0x296   : > { %v1043_v58 = vpop.f32.mrb[47].mxu0 }
 0x297   : > { %v1961_v41 = vpop.f32.mrb[32].mxu1 }
 0x298   : > { %v1167_v42 = vmax.f32 %v1054_v24, %v1961_v41  ;;  %v1114_v59 = vpop.f32.mrb[33].mxu1 }
 0x299   : > { %v1165_v60 = vmax.f32 %v1052_v26, %v1114_v59  ;;  %v1962_v61 = vpop.f32.mrb[34].mxu1 }
 0x29a   : > { %v1168_v62 = vmax.f32 %v1055_v28, %v1962_v61  ;;  %v1117_v63 = vpop.f32.mrb[35].mxu1 }
 0x29b   : > { %v1166_v0 = vmax.f32 %v1053_v30, %v1117_v63  ;;  %v1993_v1 = vpop.f32.mrb[48].mxu0 }
 0x29c   : > { %v1280_v43 = vmax.f32 %v1167_v42, %v1993_v1  ;;  %v1227_v2 = vpop.f32.mrb[49].mxu0 }
 0x29d   : > { %v1278_v3 = vmax.f32 %v1165_v60, %v1227_v2  ;;  %v1994_v44 = vpop.f32.mrb[50].mxu0 }
 0x29e   : > { %v1281_v4 = vmax.f32 %v1168_v62, %v1994_v44  ;;  %v1230_v5 = vpop.f32.mrb[51].mxu0 }
 0x29f   : > { %v1279_v6 = vmax.f32 %v1166_v0, %v1230_v5  ;;  %v1965_v7 = vpop.f32.mrb[36].mxu1 }
 0x2a0   : > { %v1130_v8 = vpop.f32.mrb[37].mxu1 }
 0x2a1   : > { %v1966_v9 = vpop.f32.mrb[38].mxu1 }
 0x2a2   : > { %v1132_v45 = vpop.f32.mrb[39].mxu1 }
 0x2a3   : > { %v1997_v10 = vpop.f32.mrb[52].mxu0 }
 0x2a4   : > { %v1243_v11 = vpop.f32.mrb[53].mxu0 }
 0x2a5   : > { %v1998_v12 = vpop.f32.mrb[54].mxu0 }
 0x2a6   : > { %v1245_v13 = vpop.f32.mrb[55].mxu0 }
 0x2a7   : > { %v1969_v14 = vpop.f32.mrb[40].mxu1 }
 0x2a8   : > { %v1142_v15 = vpop.f32.mrb[41].mxu1 }
 0x2a9   : > { %v1970_v16 = vpop.f32.mrb[42].mxu1 }
 0x2aa   : > { %v1144_v17 = vpop.f32.mrb[43].mxu1 }
 0x2ab   : > { %v2001_v18 = vpop.f32.mrb[56].mxu0 }
 0x2ac   : > { %v1255_v19 = vpop.f32.mrb[57].mxu0 }
 0x2ad   : > { %v2002_v21 = vpop.f32.mrb[58].mxu0 }
 0x2ae   : > { %v1257_v22 = vpop.f32.mrb[59].mxu0 }
 0x2af   : > { %v1973_v23 = vpop.f32.mrb[44].mxu1 }
 0x2b0   : > { %v1154_v24 = vpop.f32.mrb[45].mxu1 }
 0x2b1   : > { %v1974_v25 = vpop.f32.mrb[46].mxu1 }
 0x2b2   : > { %v1156_v26 = vpop.f32.mrb[47].mxu1 }
 0x2b3   : > { %v2005_v27 = vpop.f32.mrb[60].mxu0 }
 0x2b4   : > { %v1267_v28 = vpop.f32.mrb[61].mxu0 }
 0x2b5   : > { %v2006_v29 = vpop.f32.mrb[62].mxu0 }
 0x2b6   : > { %v1269_v30 = vpop.f32.mrb[63].mxu0 }
 0x2b7   : > { %v2025_v32 = vpop.f32.mrb[48].mxu1 }
 0x2b8   : > { %v1393_v33 = vmax.f32 %v1280_v43, %v2025_v32  ;;  %v1340_v34 = vpop.f32.mrb[49].mxu1 }
 0x2b9   : > { %v1391_v36 = vmax.f32 %v1278_v3, %v1340_v34  ;;  %v2026_v37 = vpop.f32.mrb[50].mxu1 }
 0x2ba   : > { %v1394_v38 = vmax.f32 %v1281_v4, %v2026_v37  ;;  %v1343_v46 = vpop.f32.mrb[51].mxu1 }
 0x2bb   : > { %v1392_v47 = vmax.f32 %v1279_v6, %v1343_v46  ;;  %v2057_v48 = vpop.f32.mrb[64].mxu0 }
 0x2bc   : > { %v1506_v49 = vmax.f32 %v1393_v33, %v2057_v48  ;;  %v1453_v50 = vpop.f32.mrb[65].mxu0 }
 0x2bd   : > { %v1504_v52 = vmax.f32 %v1391_v36, %v1453_v50  ;;  %v2058_v53 = vpop.f32.mrb[66].mxu0 }
 0x2be   : > { %v1534_v20 = vadd.f32 %v1525_v51, %v1506_v49  ;;  %v1507_v54 = vmax.f32 %v1394_v38, %v2058_v53  ;;  %v1456_v55 = vpop.f32.mrb[67].mxu0 }
 0x2bf   : > { %v1532_v39 = vadd.f32 %v1515_v31, %v1504_v52  ;;  %v1505_v40 = vmax.f32 %v1392_v47, %v1456_v55  ;;  %v2029_v57 = vpop.f32.mrb[52].mxu1 }
 0x2c0   : > { %v1538_v58 = vmax.f32 %v1534_v20, 0.0  ;;  %v1535_v41 = vadd.f32 %v1530_v56, %v1507_v54  ;;  %v1356_v42 = vpop.f32.mrb[53].mxu1 }
 0x2c1   : > { %v1536_v59 = vmax.f32 %v1532_v39, 0.0  ;;  %v1533_v60 = vadd.f32 %v1520_v35, %v1505_v40  ;;  %v2030_v61 = vpop.f32.mrb[54].mxu1 }
 0x2c2   : > { %1543 = vst.msk [vmem:[%s252_s24 + $0x10] sm:$0xff] %vm1540_vm3, %v1538_v58  ;;  %v1539_v62 = vmax.f32 %v1535_v41, 0.0  ;;  %v1358_v63 = vpop.f32.mrb[55].mxu1 }
 0x2c3   : > { %1541 = vst.msk [vmem:[%s252_s24] sm:$0xff] %vm1540_vm3, %v1536_v59  ;;  %v1537_v0 = vmax.f32 %v1533_v60, 0.0  ;;  %v2061_v1 = vpop.f32.mrb[68].mxu0 }
 0x2c4   : > { %1544 = vst.msk [vmem:[%s252_s24 + $0x18] sm:$0xff] %vm1540_vm3, %v1539_v62  ;;  %v1469_v43 = vpop.f32.mrb[69].mxu0 }
 0x2c5   : > { %1542 = vst.msk [vmem:[%s252_s24 + $0x8] sm:$0xff] %vm1540_vm3, %v1537_v0  ;;  %v2062_v2 = vpop.f32.mrb[70].mxu0 }
 0x2c6   : > { %v1471_v3 = vpop.f32.mrb[71].mxu0 }
 0x2c7   : > { %v2033_v44 = vpop.f32.mrb[56].mxu1 }
 0x2c8   : > { %v1368_v4 = vpop.f32.mrb[57].mxu1 }
 0x2c9   : > { %v2034_v5 = vpop.f32.mrb[58].mxu1 }
 0x2ca   : > { %v1370_v6 = vpop.f32.mrb[59].mxu1 }
 0x2cb   : > { %v2065_v7 = vpop.f32.mrb[72].mxu0 }
 0x2cc   : > { %v1481_v8 = vpop.f32.mrb[73].mxu0 }
 0x2cd   : > { %v2066_v9 = vpop.f32.mrb[74].mxu0 }
 0x2ce   : > { %v1483_v45 = vpop.f32.mrb[75].mxu0 }
 0x2cf   : > { %v2037_v10 = vpop.f32.mrb[60].mxu1 }
 0x2d0   : > { %v1380_v11 = vpop.f32.mrb[61].mxu1 }
 0x2d1   : > { %v2038_v12 = vpop.f32.mrb[62].mxu1 }
 0x2d2   : > { %v1382_v13 = vpop.f32.mrb[63].mxu1 }
 0x2d3   : > { %v2069_v14 = vpop.f32.mrb[76].mxu0 }
 0x2d4   : > { %v1493_v15 = vpop.f32.mrb[77].mxu0 }
 0x2d5   : > { %v2070_v16 = vpop.f32.mrb[78].mxu0 }
 0x2d6   : > { %v1495_v17 = vpop.f32.mrb[79].mxu0 }
 0x2d7 PF: > { %s15_s20 = sadd.s32 1, %s2144_s20   ;;  %s2532_s18 = smov %s2140_s19 }
 0x2d8   : > { %p12_p5 = scmp.ge.s32.totalorder %s15_s20, 4   ;;  %s2533_s19 = smov %s2535_s21 }
 0x2da   :  { %14 = sbr.rel (!%p12_p5) target bundleno = 2 (0x2), region = 70 }

</bundles_post_ra>
